<compile_context>
chip_gen: v6e
topology: v6e:2x2x1
jax: 0.10.0
libtpu: 0.0.40
codegen_flags: <defaults>
</compile_context>

<pallas_src>
import functools

import jax
import jax.numpy as jnp
from jax import lax
from jax.experimental import pallas as pl
from jax.experimental.pallas import tpu as pltpu

LAMBDA_PARAM = 0.005


def _barlow_twins_kernel(za_ref, zb_ref, ma_ref, ra_ref, mb_ref, rb_ref,
                         loss_ref, g_acc, pd_acc,
                         *, n_total, d_total, lambda_param):
    """One (i, j) feature tile of c, reduced over the (innermost) batch axis."""
    i = pl.program_id(0)              # row feature-strip of c
    j = pl.program_id(1)              # col feature-strip of c
    n = pl.program_id(2)              # batch tile (reduction axis, innermost)
    n_last = pl.num_programs(2) - 1

    # Fresh accumulators at the start of each (i, j) tile's batch loop.
    @pl.when(n == 0)
    def _():
        g_acc[...] = jnp.zeros_like(g_acc)
        pd_acc[...] = jnp.zeros_like(pd_acc)

    za = za_ref[...]                  # (tN, tD), native dtype (bf16 stays bf16)
    zb = zb_ref[...]                  # (tN, tD)

    # Raw cross product on the MXU: contract the batch axis of both operands
    # (== za.T @ zb with no materialised transpose), f32 accumulation.
    g_acc[...] += lax.dot_general(
        za, zb,
        dimension_numbers=(((0,), (0,)), ((), ())),
        preferred_element_type=jnp.float32)

    # Elementwise-product accumulator -> diagonal of c.  Only block-diagonal
    # tiles ever need (or read) it, so this VPU pass is gated to i == j
    # (runs on 1/(D/tD) of the grid steps).
    @pl.when(i == j)
    def _():
        pd_acc[...] += jnp.sum(
            za.astype(jnp.float32) * zb.astype(jnp.float32),
            axis=0, keepdims=True)

    # Epilogue: fold normalisation into the D x D domain and emit this tile's
    # (already scaled) partial loss.
    @pl.when(n == n_last)
    def _():
        inv_n = 1.0 / n_total
        scale = 1.0 / (d_total * 5.0)

        ma = ma_ref[...]              # (1, tD)  mean  of z_a, i-strip
        ra = ra_ref[...]              # (1, tD)  1/std of z_a, i-strip
        mb = mb_ref[...]              # (1, tD)  mean  of z_b, j-strip
        rb = rb_ref[...]              # (1, tD)  1/std of z_b, j-strip
        ma_col = jnp.transpose(ma)    # (tD, 1): tiny lane->sublane transposes,
        ra_col = jnp.transpose(ra)    #          once per (i, j) tile only

        # c_ij = (G_ij - N * mu_a_i * mu_b_j) * rstd_a_i * rstd_b_j / N
        c = (g_acc[...] - n_total * (ma_col * mb)) * (ra_col * rb) * inv_n

        # Off-diagonal weighting applied to every element of the tile; the
        # diagonal is corrected below on block-diagonal tiles (no iota masks).
        tile_loss = lambda_param * jnp.sum(c * c)
        loss_ref[...] = jnp.reshape(tile_loss * scale, (1, 1, 1, 1))

        @pl.when(i == j)
        def _():
            c_diag = (pd_acc[...] - n_total * (ma * mb)) * (ra * rb) * inv_n
            corr = jnp.sum((c_diag - 1.0) ** 2 - lambda_param * (c_diag * c_diag))
            loss_ref[...] = jnp.reshape((tile_loss + corr) * scale, (1, 1, 1, 1))


def _pick_tile(dim: int, target: int, align: int) -> int:
    """Largest `align`-multiple <= target that divides dim; else the full dim."""
    if dim <= target:
        return dim
    t = (target // align) * align
    while t >= align:
        if dim % t == 0:
            return t
        t -= align
    return dim


def _hw_config(itemsize: int):
    """VMEM-capacity-aware feature-tile target + scoped-VMEM limit."""
    try:
        vmem_cap = int(pltpu.get_tpu_info().vmem_capacity_bytes)
    except Exception:
        vmem_cap = 64 * 1024 * 1024          # conservative (v7x-sized) fallback
    if vmem_cap >= 96 * 1024 * 1024:         # v5e / v6e: 128 MiB physical VMEM
        td_target = 2048
        vmem_limit = 100 * 1024 * 1024
    else:                                    # v7x: 64 MiB per TensorCore
        td_target = 1024
        vmem_limit = 48 * 1024 * 1024
    vmem_limit = min(vmem_limit, (vmem_cap * 4) // 5)
    return td_target, vmem_limit


def barlow_twins_loss(z_a: jax.Array, z_b: jax.Array,
                      lambda_param: float = LAMBDA_PARAM, *,
                      tile_d: int | None = None, tile_n: int | None = None,
                      cast_inputs_to_bf16: bool = False) -> jax.Array:
    N, D = z_a.shape
    assert z_b.shape == (N, D), "z_a and z_b must share the same (N, D) shape"

    # --- per-feature moments: one fused O(N*D) XLA pass (two-pass variance,
    #     unbiased / ddof=1 to match torch.std; N == 1 yields nan like torch).
    #     Keeping these out of the main kernel removes all per-step moment work
    #     and makes the i/j grid axes safe to parallelise across TensorCores. ---
    za32 = z_a.astype(jnp.float32)
    zb32 = z_b.astype(jnp.float32)
    mean_a = jnp.mean(za32, axis=0, keepdims=True)                 # (1, D)
    mean_b = jnp.mean(zb32, axis=0, keepdims=True)
    var_a = jnp.sum((za32 - mean_a) ** 2, axis=0, keepdims=True) / (N - 1.0)
    var_b = jnp.sum((zb32 - mean_b) ** 2, axis=0, keepdims=True) / (N - 1.0)
    rstd_a = 1.0 / jnp.sqrt(var_a)
    rstd_b = 1.0 / jnp.sqrt(var_b)

    if cast_inputs_to_bf16:
        # Optional: halves HBM traffic and ~4x MXU throughput for f32 callers
        # (f32 accumulation is kept); off by default to preserve numerics.
        z_a = z_a.astype(jnp.bfloat16)
        z_b = z_b.astype(jnp.bfloat16)

    itemsize = jnp.dtype(z_a.dtype).itemsize
    td_target, vmem_limit = _hw_config(itemsize)

    # Feature tile (128-aligned for the MXU / lane layout; small D runs untiled).
    tD = tile_d if tile_d is not None else _pick_tile(D, td_target, 128)
    if 16 * tD * tD > vmem_limit:  # g_acc + ~3x epilogue temporaries budget
        # TODO(synk): add a zero-padding path for feature dims with no small
        # 128-aligned divisor instead of refusing them.
        raise ValueError(
            f"D={D} admits no feature tile <= {td_target}; the (tD, tD) f32 "
            f"accumulator would not fit in VMEM (tD={tD}).")

    # Batch tile: size so 2 inputs x 2 pipeline buffers use ~1/3 of the VMEM
    # budget (rest: f32 accumulator + epilogue temporaries).
    if tile_n is not None:
        tN = tile_n
    else:
        tn_target = max(128, min(1024, (vmem_limit // 3) // (4 * tD * itemsize)))
        tn_target = (tn_target // 128) * 128
        tN = _pick_tile(N, tn_target, 128)
        if tN > tn_target:                   # no 128-aligned divisor: sublane align
            tN = _pick_tile(N, tn_target, 8)
        if 4 * tN * tD * itemsize > vmem_limit // 2:
            # TODO(synk): pad the batch dimension instead of refusing awkward N.
            raise ValueError(f"N={N} admits no batch tile small enough for VMEM.")

    assert D % tD == 0 and N % tN == 0, (tD, tN, D, N)
    gi, gj, gn = D // tD, D // tD, N // tN

    kernel = functools.partial(
        _barlow_twins_kernel,
        n_total=float(N), d_total=float(D), lambda_param=float(lambda_param))

    partial_losses = pl.pallas_call(
        kernel,
        out_shape=jax.ShapeDtypeStruct((gi, gj, 1, 1), jnp.float32),
        grid_spec=pltpu.PrefetchScalarGridSpec(
            num_scalar_prefetch=0,
            grid=(gi, gj, gn),
            in_specs=[
                pl.BlockSpec((tN, tD), lambda i, j, n: (n, i)),   # z_a: batch x i-feat
                pl.BlockSpec((tN, tD), lambda i, j, n: (n, j)),   # z_b: batch x j-feat
                pl.BlockSpec((1, tD), lambda i, j, n: (0, i)),    # mean_a  (i-strip)
                pl.BlockSpec((1, tD), lambda i, j, n: (0, i)),    # rstd_a  (i-strip)
                pl.BlockSpec((1, tD), lambda i, j, n: (0, j)),    # mean_b  (j-strip)
                pl.BlockSpec((1, tD), lambda i, j, n: (0, j)),    # rstd_b  (j-strip)
            ],
            out_specs=pl.BlockSpec((1, 1, 1, 1), lambda i, j, n: (i, j, 0, 0)),
            scratch_shapes=[
                pltpu.VMEM((tD, tD), jnp.float32),   # G = sum_n za_i * zb_j
                pltpu.VMEM((1, tD), jnp.float32),    # sum_n za_k*zb_k (diag tiles)
            ],
        ),
        compiler_params=pltpu.CompilerParams(
            # Per-(i, j) partial outputs -> no cross-grid carry, so both feature
            # axes may be sharded across TensorCores (v7x megacore); the batch
            # reduction stays sequential and innermost.
            dimension_semantics=("parallel", "parallel", "arbitrary"),
            vmem_limit_bytes=int(vmem_limit),
        ),
        cost_estimate=pl.CostEstimate(
            flops=2 * N * D * D,
            transcendentals=0,
            # z_a is re-read gj times, z_b gi times (review: include re-reads).
            bytes_accessed=int(N * D * itemsize * (gi + gj) + 16 * D + 4 * gi * gj),
        ),
    )(z_a, z_b, mean_a, rstd_a, mean_b, rstd_b)

    return jnp.sum(partial_losses)


if __name__ == "__main__":
    key = jax.random.PRNGKey(0)
    k_a, k_b = jax.random.split(key)

    def reference(z_a, z_b, lambda_param=LAMBDA_PARAM):
        n, d = z_a.shape
        za_n = (z_a - z_a.mean(0)) / jnp.std(z_a, axis=0, ddof=1)
        zb_n = (z_b - z_b.mean(0)) / jnp.std(z_b, axis=0, ddof=1)
        c = jnp.matmul(za_n.T, zb_n, precision=lax.Precision.HIGHEST) / n
        eye = jnp.eye(d, dtype=c.dtype)
        c_diff = (c - eye) ** 2
        c_diff = jnp.where(jnp.eye(d, dtype=bool), c_diff, c_diff * lambda_param)
        return c_diff.sum() / d / 5.0

    # 1) tiny shape, single-tile path (blocks == full extents).
    N1, D1 = 8, 32
    z_a1 = jax.random.normal(k_a, (N1, D1), dtype=jnp.float32)
    z_b1 = jax.random.normal(k_b, (N1, D1), dtype=jnp.float32)
    loss1 = barlow_twins_loss(z_a1, z_b1)
    jax.block_until_ready(loss1)
    ref1 = reference(z_a1, z_b1)
    assert jnp.allclose(loss1, ref1, rtol=5e-4, atol=5e-4), (loss1, ref1)

    # 2) small shape with a forced multi-tile (2 x 2 x 2) grid to exercise the
    #    batch reduction, on-/off-diagonal tiles and the parallel feature axes.
    N2, D2 = 64, 256
    z_a2 = 0.5 + 1.7 * jax.random.normal(jax.random.fold_in(key, 1), (N2, D2), jnp.float32)
    z_b2 = -0.3 + 0.9 * jax.random.normal(jax.random.fold_in(key, 2), (N2, D2), jnp.float32)
    loss2 = barlow_twins_loss(z_a2, z_b2, tile_d=128, tile_n=32)
    jax.block_until_ready(loss2)
    ref2 = reference(z_a2, z_b2)
    assert jnp.allclose(loss2, ref2, rtol=5e-4, atol=5e-4), (loss2, ref2)

    print("KERNEL_OK")
</pallas_src>

<mosaic_0001>
module attributes {stable_mosaic.version = 11 : i64} {
  func.func @_barlow_twins_kernel(%arg0: i32, %arg1: i32, %arg2: i32, %arg3: memref<8x32xf32, #tpu.memory_space<vmem>>, %arg4: memref<8x32xf32, #tpu.memory_space<vmem>>, %arg5: memref<1x32xf32, #tpu.memory_space<vmem>>, %arg6: memref<1x32xf32, #tpu.memory_space<vmem>>, %arg7: memref<1x32xf32, #tpu.memory_space<vmem>>, %arg8: memref<1x32xf32, #tpu.memory_space<vmem>>, %arg9: memref<1x1x1x1xf32, #tpu.memory_space<vmem>>, %arg10: memref<32x32xf32, #tpu.memory_space<vmem>>, %arg11: memref<1x32xf32, #tpu.memory_space<vmem>>) attributes {dimension_semantics = [#tpu.dimension_semantics<parallel>, #tpu.dimension_semantics<parallel>, #tpu.dimension_semantics<arbitrary>], iteration_bounds = array<i64: 1, 1, 1>, scalar_prefetch = 0 : i64, scratch_operands = 2 : i64, tpu.core_type = #tpu.core_type<tc>, window_params = [{transform_indices = @transform_0, window_bounds = array<i64: 8, 32>}, {transform_indices = @transform_1, window_bounds = array<i64: 8, 32>}, {transform_indices = @transform_2, window_bounds = array<i64: 1, 32>}, {transform_indices = @transform_3, window_bounds = array<i64: 1, 32>}, {transform_indices = @transform_4, window_bounds = array<i64: 1, 32>}, {transform_indices = @transform_5, window_bounds = array<i64: 1, 32>}, {transform_indices = @transform_6, window_bounds = array<i64: 1, 1, 1, 1>}]} {
    %c0_i32 = arith.constant 0 : i32
    %0 = arith.cmpi eq, %arg2, %c0_i32 : i32
    %1 = arith.extui %0 : i1 to i32
    %c0_i32_0 = arith.constant 0 : i32
    %2 = arith.cmpi ne, %1, %c0_i32_0 : i32
    scf.if %2 {
      %cst_11 = arith.constant 0.000000e+00 : f32
      %15 = vector.broadcast %cst_11 : f32 to vector<32x32xf32>
      %c0_12 = arith.constant 0 : index
      %c0_13 = arith.constant 0 : index
      %16 = vector.load %arg10[%c0_12, %c0_13] : memref<32x32xf32, #tpu.memory_space<vmem>>, vector<32x32xf32>
      tpu.vector_store %arg10[%c0_12, %c0_13], %15 {strides = array<i32>} : memref<32x32xf32, #tpu.memory_space<vmem>>, vector<32x32xf32>,
      %cst_14 = arith.constant 0.000000e+00 : f32
      %17 = vector.broadcast %cst_14 : f32 to vector<1x32xf32>
      %c0_15 = arith.constant 0 : index
      %c0_16 = arith.constant 0 : index
      %18 = vector.load %arg11[%c0_15, %c0_16] : memref<1x32xf32, #tpu.memory_space<vmem>>, vector<1x32xf32>
      tpu.vector_store %arg11[%c0_15, %c0_16], %17 {strides = array<i32>} : memref<1x32xf32, #tpu.memory_space<vmem>>, vector<1x32xf32>,
    } else {
    }
    %c0 = arith.constant 0 : index
    %c0_1 = arith.constant 0 : index
    %3 = vector.load %arg3[%c0, %c0_1] : memref<8x32xf32, #tpu.memory_space<vmem>>, vector<8x32xf32>
    %c0_2 = arith.constant 0 : index
    %c0_3 = arith.constant 0 : index
    %4 = vector.load %arg4[%c0_2, %c0_3] : memref<8x32xf32, #tpu.memory_space<vmem>>, vector<8x32xf32>
    %c0_4 = arith.constant 0 : index
    %c0_5 = arith.constant 0 : index
    %5 = vector.load %arg10[%c0_4, %c0_5] : memref<32x32xf32, #tpu.memory_space<vmem>>, vector<32x32xf32>
    %cst = arith.constant dense<0.000000e+00> : vector<32x32xf32>
    %6 = tpu.matmul %3, %4, %cst {dimension_numbers = #tpu.dot_dimension_numbers<[0], [0], [1], [1], [0, 1, 1, 1], [], []>} : vector<8x32xf32>, vector<8x32xf32>, vector<32x32xf32> -> vector<32x32xf32>
    %7 = arith.addf %5, %6 : vector<32x32xf32>
    %c0_6 = arith.constant 0 : index
    %c0_7 = arith.constant 0 : index
    %8 = vector.load %arg10[%c0_6, %c0_7] : memref<32x32xf32, #tpu.memory_space<vmem>>, vector<32x32xf32>
    tpu.vector_store %arg10[%c0_6, %c0_7], %7 {strides = array<i32>} : memref<32x32xf32, #tpu.memory_space<vmem>>, vector<32x32xf32>,
    %9 = arith.cmpi eq, %arg0, %arg1 : i32
    %10 = arith.extui %9 : i1 to i32
    %c0_i32_8 = arith.constant 0 : i32
    %11 = arith.cmpi ne, %10, %c0_i32_8 : i32
    scf.if %11 {
      %c0_11 = arith.constant 0 : index
      %c0_12 = arith.constant 0 : index
      %15 = vector.load %arg11[%c0_11, %c0_12] : memref<1x32xf32, #tpu.memory_space<vmem>>, vector<1x32xf32>
      %16 = arith.mulf %3, %4 : vector<8x32xf32>
      %cst_13 = arith.constant dense<0.000000e+00> : vector<32xf32>
      %17 = vector.multi_reduction <add>, %16, %cst_13 [0] : vector<8x32xf32> to vector<32xf32>
      %18 = vector.shape_cast %17 : vector<32xf32> to vector<1x32xf32>
      %19 = arith.addf %15, %18 : vector<1x32xf32>
      %c0_14 = arith.constant 0 : index
      %c0_15 = arith.constant 0 : index
      %20 = vector.load %arg11[%c0_14, %c0_15] : memref<1x32xf32, #tpu.memory_space<vmem>>, vector<1x32xf32>
      tpu.vector_store %arg11[%c0_14, %c0_15], %19 {strides = array<i32>} : memref<1x32xf32, #tpu.memory_space<vmem>>, vector<1x32xf32>,
    } else {
    }
    %c0_i32_9 = arith.constant 0 : i32
    %12 = arith.cmpi eq, %arg2, %c0_i32_9 : i32
    %13 = arith.extui %12 : i1 to i32
    %c0_i32_10 = arith.constant 0 : i32
    %14 = arith.cmpi ne, %13, %c0_i32_10 : i32
    scf.if %14 {
      %c0_11 = arith.constant 0 : index
      %c0_12 = arith.constant 0 : index
      %15 = vector.load %arg5[%c0_11, %c0_12] : memref<1x32xf32, #tpu.memory_space<vmem>>, vector<1x32xf32>
      %c0_13 = arith.constant 0 : index
      %c0_14 = arith.constant 0 : index
      %16 = vector.load %arg6[%c0_13, %c0_14] : memref<1x32xf32, #tpu.memory_space<vmem>>, vector<1x32xf32>
      %c0_15 = arith.constant 0 : index
      %c0_16 = arith.constant 0 : index
      %17 = vector.load %arg7[%c0_15, %c0_16] : memref<1x32xf32, #tpu.memory_space<vmem>>, vector<1x32xf32>
      %c0_17 = arith.constant 0 : index
      %c0_18 = arith.constant 0 : index
      %18 = vector.load %arg8[%c0_17, %c0_18] : memref<1x32xf32, #tpu.memory_space<vmem>>, vector<1x32xf32>
      %19 = tpu.transpose %15, [1, 0] : vector<1x32xf32> -> vector<32x1xf32>
      %20 = tpu.transpose %16, [1, 0] : vector<1x32xf32> -> vector<32x1xf32>
      %c0_19 = arith.constant 0 : index
      %c0_20 = arith.constant 0 : index
      %21 = vector.load %arg10[%c0_19, %c0_20] : memref<32x32xf32, #tpu.memory_space<vmem>>, vector<32x32xf32>
      %22 = vector.broadcast %19 : vector<32x1xf32> to vector<32x32xf32>
      %23 = vector.broadcast %17 : vector<1x32xf32> to vector<32x32xf32>
      %24 = arith.mulf %22, %23 : vector<32x32xf32>
      %cst_21 = arith.constant 8.000000e+00 : f32
      %25 = vector.broadcast %cst_21 : f32 to vector<32x32xf32>
      %26 = arith.mulf %25, %24 : vector<32x32xf32>
      %27 = arith.subf %21, %26 : vector<32x32xf32>
      %28 = vector.broadcast %20 : vector<32x1xf32> to vector<32x32xf32>
      %29 = vector.broadcast %18 : vector<1x32xf32> to vector<32x32xf32>
      %30 = arith.mulf %28, %29 : vector<32x32xf32>
      %31 = arith.mulf %27, %30 : vector<32x32xf32>
      %cst_22 = arith.constant 1.250000e-01 : f32
      %32 = vector.broadcast %cst_22 : f32 to vector<32x32xf32>
      %33 = arith.mulf %31, %32 : vector<32x32xf32>
      %34 = arith.mulf %33, %33 : vector<32x32xf32>
      %35 = vector.shape_cast %34 : vector<32x32xf32> to vector<1x32x32xf32>
      %cst_23 = arith.constant dense<0.000000e+00> : vector<1xf32>
      %36 = vector.multi_reduction <add>, %35, %cst_23 [1, 2] : vector<1x32x32xf32> to vector<1xf32>
      %37 = vector.shape_cast %36 : vector<1xf32> to vector<1x1x1xf32>
      %38 = vector.extract %37[0, 0, 0] : f32 from vector<1x1x1xf32>
      %cst_24 = arith.constant 5.000000e-03 : f32
      %39 = arith.mulf %cst_24, %38 : f32
      %cst_25 = arith.constant 6.250000e-03 : f32
      %40 = arith.mulf %39, %cst_25 : f32
      %41 = vector.broadcast %40 : f32 to vector<1x1x1x1xf32>
      %c0_26 = arith.constant 0 : index
      %c0_27 = arith.constant 0 : index
      %c0_28 = arith.constant 0 : index
      %c0_29 = arith.constant 0 : index
      %42 = vector.load %arg9[%c0_26, %c0_27, %c0_28, %c0_29] : memref<1x1x1x1xf32, #tpu.memory_space<vmem>>, vector<1x1x1x1xf32>
      tpu.vector_store %arg9[%c0_26, %c0_27, %c0_28, %c0_29], %41 {strides = array<i32>} : memref<1x1x1x1xf32, #tpu.memory_space<vmem>>, vector<1x1x1x1xf32>,
      %43 = arith.cmpi eq, %arg0, %arg1 : i32
      %44 = arith.extui %43 : i1 to i32
      %c0_i32_30 = arith.constant 0 : i32
      %45 = arith.cmpi ne, %44, %c0_i32_30 : i32
      scf.if %45 {
        %c0_31 = arith.constant 0 : index
        %c0_32 = arith.constant 0 : index
        %46 = vector.load %arg11[%c0_31, %c0_32] : memref<1x32xf32, #tpu.memory_space<vmem>>, vector<1x32xf32>
        %47 = arith.mulf %15, %17 : vector<1x32xf32>
        %cst_33 = arith.constant 8.000000e+00 : f32
        %48 = vector.broadcast %cst_33 : f32 to vector<1x32xf32>
        %49 = arith.mulf %48, %47 : vector<1x32xf32>
        %50 = arith.subf %46, %49 : vector<1x32xf32>
        %51 = arith.mulf %16, %18 : vector<1x32xf32>
        %52 = arith.mulf %50, %51 : vector<1x32xf32>
        %cst_34 = arith.constant 1.250000e-01 : f32
        %53 = vector.broadcast %cst_34 : f32 to vector<1x32xf32>
        %54 = arith.mulf %52, %53 : vector<1x32xf32>
        %cst_35 = arith.constant 1.000000e+00 : f32
        %55 = vector.broadcast %cst_35 : f32 to vector<1x32xf32>
        %56 = arith.subf %54, %55 : vector<1x32xf32>
        %57 = arith.mulf %56, %56 : vector<1x32xf32>
        %58 = arith.mulf %54, %54 : vector<1x32xf32>
        %cst_36 = arith.constant 5.000000e-03 : f32
        %59 = vector.broadcast %cst_36 : f32 to vector<1x32xf32>
        %60 = arith.mulf %59, %58 : vector<1x32xf32>
        %61 = arith.subf %57, %60 : vector<1x32xf32>
        %62 = vector.shape_cast %61 : vector<1x32xf32> to vector<1x1x32xf32>
        %cst_37 = arith.constant dense<0.000000e+00> : vector<1xf32>
        %63 = vector.multi_reduction <add>, %62, %cst_37 [1, 2] : vector<1x1x32xf32> to vector<1xf32>
        %64 = vector.shape_cast %63 : vector<1xf32> to vector<1x1x1xf32>
        %65 = vector.extract %64[0, 0, 0] : f32 from vector<1x1x1xf32>
        %66 = arith.addf %39, %65 : f32
        %cst_38 = arith.constant 6.250000e-03 : f32
        %67 = arith.mulf %66, %cst_38 : f32
        %68 = vector.broadcast %67 : f32 to vector<1x1x1x1xf32>
        %c0_39 = arith.constant 0 : index
        %c0_40 = arith.constant 0 : index
        %c0_41 = arith.constant 0 : index
        %c0_42 = arith.constant 0 : index
        %69 = vector.load %arg9[%c0_39, %c0_40, %c0_41, %c0_42] : memref<1x1x1x1xf32, #tpu.memory_space<vmem>>, vector<1x1x1x1xf32>
        tpu.vector_store %arg9[%c0_39, %c0_40, %c0_41, %c0_42], %68 {strides = array<i32>} : memref<1x1x1x1xf32, #tpu.memory_space<vmem>>, vector<1x1x1x1xf32>,
      } else {
      }
    } else {
    }
    return
  }
  func.func @transform_0(%arg0: i32, %arg1: i32, %arg2: i32) -> (i32, i32) {
    %c0_i32 = arith.constant 0 : i32
    return %arg2, %arg0 : i32, i32
  }
  func.func @transform_1(%arg0: i32, %arg1: i32, %arg2: i32) -> (i32, i32) {
    %c0_i32 = arith.constant 0 : i32
    return %arg2, %arg1 : i32, i32
  }
  func.func @transform_2(%arg0: i32, %arg1: i32, %arg2: i32) -> (i32, i32) {
    %c0_i32 = arith.constant 0 : i32
    %c0_i32_0 = arith.constant 0 : i32
    return %c0_i32, %arg0 : i32, i32
  }
  func.func @transform_3(%arg0: i32, %arg1: i32, %arg2: i32) -> (i32, i32) {
    %c0_i32 = arith.constant 0 : i32
    %c0_i32_0 = arith.constant 0 : i32
    return %c0_i32, %arg0 : i32, i32
  }
  func.func @transform_4(%arg0: i32, %arg1: i32, %arg2: i32) -> (i32, i32) {
    %c0_i32 = arith.constant 0 : i32
    %c0_i32_0 = arith.constant 0 : i32
    return %c0_i32, %arg1 : i32, i32
  }
  func.func @transform_5(%arg0: i32, %arg1: i32, %arg2: i32) -> (i32, i32) {
    %c0_i32 = arith.constant 0 : i32
    %c0_i32_0 = arith.constant 0 : i32
    return %c0_i32, %arg1 : i32, i32
  }
  func.func @transform_6(%arg0: i32, %arg1: i32, %arg2: i32) -> (i32, i32, i32, i32) {
    %c0_i32 = arith.constant 0 : i32
    %c0_i32_0 = arith.constant 0 : i32
    %c0_i32_1 = arith.constant 0 : i32
    return %arg0, %arg1, %c0_i32, %c0_i32_0 : i32, i32, i32, i32
  }
}

</mosaic_0001>

<bundles_post_ra>
// kernel: tpu_custom_call.1
= control target key start
LH: loop header
LB: loop body
LE: loop exit
PB: predicated region body
PF: predicated region fallthrough
CT: control target
= control target key end

     0   :  { %11 = vsyncpa [#allocation5], 0  ;;  %s616_s0 = inlined_call_operand.hbm [shape: f32[8,32], index: 0, kind: input, shape index: {}]   ;;  %s617_s1 = inlined_call_operand.hbm [shape: f32[8,32], index: 1, kind: input, shape index: {}]   ;;  %s618_s2 = inlined_call_operand.vmem [shape: f32[1,32], index: 2, kind: input, shape index: {}]   ;;  %s619_s3 = inlined_call_operand.vmem [shape: f32[1,32], index: 3, kind: input, shape index: {}]   ;;  %s620_s4 = inlined_call_operand.vmem [shape: f32[1,32], index: 4, kind: input, shape index: {}]   ;;  %s621_s5 = inlined_call_operand.vmem [shape: f32[1,32], index: 5, kind: input, shape index: {}]   ;;  %s622_s6 = inlined_call_operand.hbm [shape: f32[1,1,1,1], index: 6, kind: output, shape index: {}]  }
   0x1   :  { %12 = vsyncpa [#allocation8], 0 }
   0x2   :  { %13 = vsyncpa [#allocation6], 0  ;;  %s539_s21 = smov [#allocation4]   ;;  %s540_s23 = smov [#allocation7]  }
   0x3   :  { %s20_s22 = sshll.u32 %s539_s21, 4  ;;  %s30_s24 = sshll.u32 %s540_s23, 4  ;;  %s21_s22 = int_to_ptr.vmem [resolvable:$true] %s20_s22  ;;  %s31_s24 = int_to_ptr.vmem [resolvable:$true] %s30_s24 }
   0x4   :  { %s481_s25 = scalar_lea.vmem %s21_s22, 128  ;;  %p486_p1 = scmp.lt.s32.totalorder %s21_s22, %s21_s22 }
   0x5   :  { %p482_p0 = scmp.ne.s32.totalorder %s21_s22, %s481_s25  ;;  %p487_p2 = scmp.lt.s32.totalorder %s481_s25, %s481_s25 }
   0x7   :  { %p488_p3 = por %p487_p2, %p486_p1 }
   0x9   :  { %p489_p4 = pnand %p488_p3, %p482_p0 }
   0xb   :  { %492 = shalt.err (!%p489_p4)
}
   0xc   :  { %23 = dma.hbm_to_vmem [thread:$0]  %s616_s0, 128, %s21_s22, [#allocation5]  }
   0xd   :  { %s501_s28 = scalar_lea.vmem %s31_s24, 128  ;;  %p506_p6 = scmp.lt.s32.totalorder %s31_s24, %s31_s24 }
   0xe   :  { %p502_p5 = scmp.ne.s32.totalorder %s31_s24, %s501_s28  ;;  %p507_p7 = scmp.lt.s32.totalorder %s501_s28, %s501_s28 }
  0x10   :  { %p508_p8 = por %p507_p7, %p506_p6 }
  0x12   :  { %p509_p9 = pnand %p508_p8, %p502_p5 }
  0x14   :  { %512 = shalt.err (!%p509_p9)
}
  0x15   :  { %33 = dma.hbm_to_vmem [thread:$0]  %s617_s1, 128, %s31_s24, [#allocation8]  }
  0x16   :  { %533 = dma.done.wait [#allocation5], 128  }
  0x17   :  { %534 = vsyncadd [#allocation5], 4294967168 }
  0x18   :  { %535 = dma.done.wait [#allocation8], 128  }
  0x19   :  { %536 = vsyncadd [#allocation8], 4294967168  ;;  %v59_v0 = vld [vmem:[#allocation4] sm:$0xff]  ;;  %v60_v1 = vld [vmem:[#allocation7] sm:$0xff]  ;;  %v541_v5 = vmov 0   ;;  %vm97_vm0 = vcmask 64512   ;;  %v316_v45 = vlaneseq }
  0x1a   :  { %65 = vxpose.xlu0.b32.start.end [1/1] (short) (narrow) %v59_v0, 32  ;;  %v209_v2 = vmul.f32 %v60_v1, %v59_v0  ;;  %v224_v3 = vld [vmem:[%s619_s3] sm:$0x1]  ;;  %452 = vmatprep.subr.mxu0 %v60_v1  ;;  %vm52_vm1 = vcmask 261120   ;;  %v542_v18 = vmov 0.0   ;;  %vm57_vm2 = vcmask 253952  }
  0x1b   :  { %259 = vxpose.xlu1.b32.start.end [1/1] (short) (narrow) %v224_v3, 32  ;;  %453 = vmatpush3.msra.mxu0 %v60_v1  ;;  %v223_v4 = vld [vmem:[%s618_s2] sm:$0x1]  ;;  %54 = vst.msk [vmem:[#allocation2 + $0x8] sm:$0xff] %vm52_vm1, %v542_v18  ;;  %53 = vst.msk [vmem:[#allocation2] sm:$0xff] %vm52_vm1, %v542_v18  ;;  %v317_v47 = vshrl.u32 %v316_v45, 7 }
  0x1c   :  { %460 = vmatprep.subr.mxu1 %v60_v1  ;;  %55 = vst.msk [vmem:[#allocation2 + $0x10] sm:$0xff] %vm52_vm1, %v542_v18  ;;  %56 = vst.msk [vmem:[#allocation2 + $0x18] sm:$0xff] %vm52_vm1, %v542_v18  ;;  %v210_v19 = vsel %vm52_vm1, %v209_v2, 0.0  ;;  %v225_v28 = vld [vmem:[%s620_s4] sm:$0x1]  ;;  %s543_s12 = smov [#allocation9]  }
  0x1d   :  { %461 = vmatpush3.msra.mxu1 %v60_v1  ;;  %v211_v20 = vrot.slane %v210_v19, 4  ;;  %58 = vst.msk [vmem:[#allocation3] sm:$0x1] %vm57_vm2, %v542_v18  ;;  %v400_v29 = vmul.f32 %v225_v28, %v223_v4  ;;  %v226_v31 = vld [vmem:[%s621_s5] sm:$0x1]  ;;  %v318_v48 = vsub.s32 0, %v317_v47 }
  0x1e   :  { %v403_v32 = vmul.f32 %v226_v31, %v224_v3  ;;  %s432_s13 = sshll.u32 %s543_s12, 4  ;;  %vm394_vm3 = vcmask 0   ;;  %s433_s13 = int_to_ptr.vmem [resolvable:$true] %s432_s13 }
  0x1f   :  { %v212_v21 = vadd.f32 %v211_v20, %v210_v19  ;;  %v401_v30 = vmul.f32 8.0, %v400_v29  ;;  %v319_v54 = vrot.slane %v225_v28, %v318_v48  ;;  %v357_v61 = vrot.slane %v226_v31, %v318_v48  ;;  %s513_s17 = scalar_lea.vmem %s433_s13, 16  ;;  %s517_s18 = scalar_lea.vmem %s433_s13, 32 }
  0x20   :  { %p514_p10 = scmp.ne.s32.totalorder %s433_s13, %s513_s17  ;;  %p518_p11 = scmp.lt.s32.totalorder %s433_s13, %s433_s13 }
  0x21   :  { %v213_v22 = vrot.slane %v212_v21, 2  ;;  %p519_p12 = scmp.lt.s32.totalorder %s517_s18, %s513_s17 }
  0x22   :  { %v62_v50 = vld [vmem:[#allocation2 + $0x8] sm:$0xff]  ;;  %v61_v52 = vld [vmem:[#allocation2] sm:$0xff] }
  0x23   :  { %v214_v23 = vadd.f32 %v213_v22, %v212_v21  ;;  %v64_v60 = vld [vmem:[#allocation2 + $0x18] sm:$0xff]  ;;  %v63_v1 = vld [vmem:[#allocation2 + $0x10] sm:$0xff]  ;;  %p520_p13 = por %p519_p12, %p518_p11 }
  0x24   :  { %v208_v26 = vld [vmem:[#allocation3] sm:$0x1] }
  0x25   :  { %v215_v24 = vrot.slane %v214_v23, 1  ;;  %p521_p0 = pnand %p520_p13, %p514_p10 }
  0x27   :  { %227 = vxpose.xlu0.b32.start.end [1/1] (short) (narrow) %v223_v4, 32  ;;  %v216_v25 = vadd.f32 %v215_v24, %v214_v23 }
  0x29   :  { %v217_v27 = vadd.f32 %v216_v25, %v208_v26 }
  0x2b   :  { %219 = vst.msk [vmem:[#allocation3] sm:$0x1] %vm57_vm2, %v217_v27 }
  0x32   :  { %v399_v33 = vld [vmem:[#allocation3] sm:$0x1] }
  0x33   :  { %v402_v34 = vsub.f32 %v399_v33, %v401_v30 }
  0x35   :  { %v404_v35 = vmul.f32 %v403_v32, %v402_v34 }
  0x37   :  { %v405_v36 = vmul.f32 0.125, %v404_v35 }
  0x39   :  { %471 = vset.pattern.permute.xlu1 %v541_v5  ;;  %v446_v37 = vadd.f32 -1.0, %v405_v36  ;;  %v408_v38 = vmul.f32 %v405_v36, %v405_v36 }
  0x3b   :  { %v407_v39 = vmul.f32 %v446_v37, %v446_v37  ;;  %v409_v40 = vmul.f32 0.005, %v408_v38 }
  0x3d   :  { %v410_v41 = vsub.f32 %v407_v39, %v409_v40 }
  0x3f   :  { %v412_v42 = vsel %vm57_vm2, %v410_v41, 0.0 }
  0x50   :  { %472 = vset.pattern.permute.xlu0 %v541_v5 }
  0x96   :  { %v81_v6 = vpop.trf.xlu0 }
  0x97   :  { %454 = vmatprep.mubr.msk.f32.mxu0 %vm97_vm0, %v81_v6  ;;  %v275_v11 = vpop.trf.xlu1 }
  0x9a   :  { %v82_v7 = vpop.trf.xlu0 }
  0x9b   :  { %455 = vmatmul.mubr.msk.f32.vlgmr.msra.gmra.mxu0 %vm97_vm0, %v82_v7  ;;  %v276_v13 = vpop.trf.xlu1 }
  0x9e   :  { %v83_v8 = vpop.trf.xlu0 }
  0x9f   :  { %457 = vmatprep.mubr.msk.f32.mxu1 %vm97_vm0, %v83_v8  ;;  %v277_v15 = vpop.trf.xlu1 }
  0xa2   :  { %v84_v9 = vpop.trf.xlu0 }
  0xa3   :  { %458 = vmatmul.mubr.msk.f32.vlgmr.msra.gmra.mxu1 %vm97_vm0, %v84_v9  ;;  %v278_v17 = vpop.trf.xlu1 }
  0xa6   :  { %v243_v10 = vpop.trf.xlu0 }
  0xa7   :  { %297 = vperm.xlu1 %471, %v243_v10  }
  0xaa   :  { %v244_v12 = vpop.trf.xlu0 }
  0xab   :  { %335 = vperm.xlu1 %471, %v275_v11   ;;  %302 = vperm.xlu0 %472, %v244_v12  }
  0xae   :  { %v245_v14 = vpop.trf.xlu0 }
  0xaf   :  { %340 = vperm.xlu1 %471, %v276_v13  }
  0xb2   :  { %v246_v16 = vpop.trf.xlu0 }
  0xb3   :  { %307 = vperm.xlu1 %471, %v245_v14  }
  0xb7   :  { %345 = vperm.xlu1 %471, %v277_v15  }
  0xbb   :  { %312 = vperm.xlu1 %471, %v246_v16  }
  0xbf   :  { %350 = vperm.xlu1 %471, %v278_v17  }
  0xe3   :  { %413 = vadd.xlane.f32.xlu1 %v412_v42 }
 0x122   :  { %v298_v43 = vpop.permute.xlu1 %297 }
 0x123   :  { %v321_v62 = vmul.f32 %v319_v54, %v298_v43 }
 0x125   :  { %v325_v6 = vmul.f32 8.0, %v321_v62 }
 0x126   :  { %v336_v44 = vpop.permute.xlu1 %335  ;;  %v303_v53 = vpop.permute.xlu0 %302 }
 0x127   :  { %v322_v58 = vmul.f32 %v319_v54, %v303_v53  ;;  %v359_v11 = vmul.f32 %v357_v61, %v336_v44 }
 0x129   :  { %v326_v63 = vmul.f32 8.0, %v322_v58 }
 0x12a   :  { %v341_v46 = vpop.permute.xlu1 %340 }
 0x12b   :  { %v360_v7 = vmul.f32 %v357_v61, %v341_v46 }
 0x12e   :  { %v308_v49 = vpop.permute.xlu1 %307 }
 0x12f   :  { %v323_v15 = vmul.f32 %v319_v54, %v308_v49 }
 0x131   :  { %v327_v23 = vmul.f32 8.0, %v323_v15 }
 0x132   :  { %v346_v59 = vpop.permute.xlu1 %345 }
 0x133   :  { %v361_v27 = vmul.f32 %v357_v61, %v346_v59 }
 0x136   :  { %v313_v3 = vpop.permute.xlu1 %312 }
 0x137   :  { %v324_v12 = vmul.f32 %v319_v54, %v313_v3 }
 0x139   :  { %v328_v19 = vmul.f32 8.0, %v324_v12 }
 0x13a   :  { %v351_v18 = vpop.permute.xlu1 %350 }
 0x13b   :  { %v362_v24 = vmul.f32 %v357_v61, %v351_v18 }
 0x15b   :  { %v456_v51 = vpop.f32.mrf.mxu0 }
 0x15c   :  { %v196_v55 = vadd.f32 %v456_v51, %v62_v50 }
 0x15d   :  { %v176_v56 = vpop.f32.mrf.mxu0 }
 0x15e   :  { %201 = vst.msk [vmem:[#allocation2 + $0x8] sm:$0xff] %vm52_vm1, %v196_v55  ;;  %v195_v57 = vadd.f32 %v176_v56, %v61_v52 }
 0x160   :  { %200 = vst.msk [vmem:[#allocation2] sm:$0xff] %vm52_vm1, %v195_v57 }
 0x163   :  { %v459_v0 = vpop.f32.mrf.mxu1 }
 0x164   :  { %v198_v2 = vadd.f32 %v459_v0, %v64_v60 }
 0x165   :  { %v292_v4 = vld [vmem:[#allocation2 + $0x8] sm:$0xff]  ;;  %v186_v5 = vpop.f32.mrf.mxu1 }
 0x166   :  { %v330_v8 = vsub.f32 %v292_v4, %v326_v63  ;;  %203 = vst.msk [vmem:[#allocation2 + $0x18] sm:$0xff] %vm52_vm1, %v198_v2  ;;  %v197_v9 = vadd.f32 %v186_v5, %v63_v1 }
 0x167   :  { %v291_v10 = vld [vmem:[#allocation2] sm:$0xff] }
 0x168   :  { %v364_v13 = vmul.f32 %v360_v7, %v330_v8  ;;  %202 = vst.msk [vmem:[#allocation2 + $0x10] sm:$0xff] %vm52_vm1, %v197_v9  ;;  %v329_v14 = vsub.f32 %v291_v10, %v325_v6 }
 0x16a   :  { %v368_v16 = vmul.f32 0.125, %v364_v13  ;;  %v363_v17 = vmul.f32 %v359_v11, %v329_v14 }
 0x16c   :  { %v372_v20 = vmul.f32 %v368_v16, %v368_v16  ;;  %v367_v21 = vmul.f32 0.125, %v363_v17  ;;  %v414_v43 = vpop.xlane.xlu1 %413 }
 0x16d   :  { %v294_v22 = vld [vmem:[#allocation2 + $0x18] sm:$0xff]  ;;  %v415_v44 = vrot.slane %v414_v43, 4 }
 0x16e   :  { %v332_v25 = vsub.f32 %v294_v22, %v328_v19  ;;  %v371_v26 = vmul.f32 %v367_v21, %v367_v21  ;;  %v376_v32 = vsel %vm52_vm1, %v372_v20, 0.0 }
 0x16f   :  { %v293_v28 = vld [vmem:[#allocation2 + $0x10] sm:$0xff]  ;;  %v416_v45 = vadd.f32 %v415_v44, %v414_v43 }
 0x170   :  { %v331_v29 = vsub.f32 %v293_v28, %v327_v23  ;;  %v366_v30 = vmul.f32 %v362_v24, %v332_v25  ;;  %v375_v31 = vsel %vm52_vm1, %v371_v26, 0.0 }
 0x171   :  { %v377_v33 = vadd.f32 %v376_v32, %v375_v31  ;;  %v417_v46 = vrot.slane %v416_v45, 2 }
 0x172   :  { %v365_v34 = vmul.f32 %v361_v27, %v331_v29  ;;  %v370_v35 = vmul.f32 0.125, %v366_v30 }
 0x173   :  { %v418_v50 = vadd.f32 %v417_v46, %v416_v45 }
 0x174   :  { %v369_v36 = vmul.f32 0.125, %v365_v34  ;;  %v374_v38 = vmul.f32 %v370_v35, %v370_v35 }
 0x175   :  { %v419_v53 = vrot.slane %v418_v50, 1 }
 0x176   :  { %v373_v37 = vmul.f32 %v369_v36, %v369_v36  ;;  %v380_v41 = vsel %vm52_vm1, %v374_v38, 0.0 }
 0x177   :  { %v420_v56 = vadd.f32 %v419_v53, %v418_v50 }
 0x178   :  { %v378_v39 = vsel %vm52_vm1, %v373_v37, 0.0 }
 0x179   :  { %v379_v40 = vadd.f32 %v378_v39, %v377_v33 }
 0x17b   :  { %v381_v42 = vadd.f32 %v380_v41, %v379_v40 }
 0x17d   :  { %382 = vadd.xlane.f32.xlu0 %v381_v42 }
 0x206   :  { %v383_v47 = vpop.xlane.xlu0 %382 }
 0x207   :  { %v384_v48 = vrot.slane %v383_v47, 4 }
 0x209   :  { %v385_v49 = vadd.f32 %v384_v48, %v383_v47 }
 0x20b   :  { %v386_v51 = vrot.slane %v385_v49, 2 }
 0x20d   :  { %v387_v52 = vadd.f32 %v386_v51, %v385_v49 }
 0x20f   :  { %v388_v54 = vrot.slane %v387_v52, 1 }
 0x211   :  { %v389_v55 = vadd.f32 %v388_v54, %v387_v52 }
 0x213   :  { %462 = vpush %v389_v55 }
 0x214   :  { %464 = vpush %v420_v56 }
 0x244   :  { %s463_s4 = spop %462 }
 0x245   :  { %s391_s5 = smul.f32 0.005, %s463_s4  ;;  %s465_s11 = spop %464 }
 0x247   :  { %s392_s14 = smul.f32 0.00625, %s391_s5  ;;  %s422_s15 = sadd.f32 %s465_s11, %s391_s5 }
 0x249   :  { %v393_v57 = vstv %s392_s14  ;;  %s423_s16 = smul.f32 0.00625, %s422_s15 }
 0x24a   :  { %395 = vst.msk [vmem:[#allocation9] sm:$0x1] %vm394_vm3, %v393_v57 }
 0x24b   :  { %v424_v58 = vstv %s423_s16 }
 0x24c   :  { %425 = vst.msk [vmem:[#allocation9] sm:$0x1] %vm394_vm3, %v424_v58 }
 0x24d   :  { %524 = shalt.err (!%p521_p0)
}
 0x24e   :  { %435 = dma.vmem_to_hbm [thread:$0]  %s433_s13, 16, %s622_s6, [#allocation6]  }
 0x24f   :  { %537 = dma.done.wait [#allocation6], 16  }
 0x250   :  { %538 = vsyncadd [#allocation6], 4294967280 }
 0x251   :  { %439 = vsyncpa [#allocation5], 1 }
 0x252   :  { %440 = vsyncpa [#allocation8], 1 }
 0x253   :  { %441 = vsyncpa [#allocation6], 1 }

</bundles_post_ra>
